<compile_context>
chip_gen: v6e
topology: v6e:2x2x1
jax: 0.10.0
libtpu: 0.0.40
codegen_flags: <defaults>
</compile_context>

<pallas_src>
import functools

import jax
import jax.numpy as jnp
from jax.experimental import pallas as pl
from jax.experimental.pallas import tpu as pltpu


def _round_up(x, m):
    return ((x + m - 1) // m) * m


def _classifier_kernel(x_ref, w1_ref, b1_ref, w2_ref, b2_ref, o_ref):
    # x_ref : (tm, H) f32          w1_ref: (H, F_pad) bf16/f32   b1_ref: (1, F_pad) f32
    # w2_ref: (F_pad, L) bf16/f32  b2_ref: (1, L) f32            o_ref : (tm, L) f32
    x = x_ref[...].astype(w1_ref.dtype)                       # in-register cast (VPU)
    h = jnp.dot(x, w1_ref[...], preferred_element_type=jnp.float32)
    h = jnp.maximum(h + b1_ref[...], 0.0)                     # folded-BN bias + ReLU, f32
    # dropout: identity in eval mode
    h = h.astype(w2_ref.dtype)                                # back to MXU-native dtype
    out = jnp.dot(h, w2_ref[...], preferred_element_type=jnp.float32)
    o_ref[...] = (out + b2_ref[...]).astype(o_ref.dtype)      # narrow (tm, L) store


def prepare_classifier_params(params, *, compute_dtype=jnp.bfloat16, eps=1e-5):
    """One-time weight prep (hoisted out of the per-call path).

    Folds both eval-mode BatchNorm affines into fc1 (exact), zero-pads fc_hidden to a
    lane multiple, transposes for x @ W layout, and casts weights to the MXU dtype.
    """
    a0 = params["bn_gamma"] / jnp.sqrt(params["bn_var"] + eps)
    c0 = params["bn_beta"] - params["bn_mean"] * a0
    a1 = params["bn1_gamma"] / jnp.sqrt(params["bn1_var"] + eps)
    c1 = params["bn1_beta"] - params["bn1_mean"] * a1

    w1 = params["fc1_w"]            # (fc_hidden, hidden)
    b1 = params["fc1_b"]            # (fc_hidden,)
    w2 = params["fc_out_w"]         # (num_labels, fc_hidden)
    b2 = params["fc_out_b"]         # (num_labels,)
    fc_hidden, hidden = w1.shape
    num_labels = w2.shape[0]

    # h = ((x*a0 + c0) @ W1^T + b1) * a1 + c1  ==  x @ W1' + b1'
    w1f = (a0[:, None] * w1.T) * a1[None, :]                                   # (H, F)
    b1f = (jnp.dot(c0, w1.T, precision=jax.lax.Precision.HIGHEST) * a1
           + b1 * a1 + c1)                                                     # (F,)

    # Zero-pad fc_hidden to a lane multiple (exact: padded h columns are ReLU(0)=0 and
    # hit zero rows of W2').
    F_pad = _round_up(fc_hidden, 128)
    w1p = jnp.zeros((hidden, F_pad), jnp.float32).at[:, :fc_hidden].set(w1f)
    b1p = jnp.zeros((1, F_pad), jnp.float32).at[:, :fc_hidden].set(b1f)
    w2p = jnp.zeros((F_pad, num_labels), jnp.float32).at[:fc_hidden, :].set(w2.T)
    b2p = b2.reshape(1, num_labels)

    return {
        "w1": w1p.astype(compute_dtype),   # (H, F_pad)
        "b1": b1p,                         # (1, F_pad) f32
        "w2": w2p.astype(compute_dtype),   # (F_pad, num_labels)
        "b2": b2p,                         # (1, num_labels) f32
    }


@functools.partial(jax.jit, static_argnames=("tm",))
def custom_classifier_forward(x, prepared, *, tm=None):
    """x: (batch, seq_len, hidden) float32. Returns (batch, seq_len, num_labels) float32."""
    batch, seq_len, hidden = x.shape
    N = batch * seq_len
    x2d = x.reshape(N, hidden)

    w1 = prepared["w1"]
    b1 = prepared["b1"]
    w2 = prepared["w2"]
    b2 = prepared["b2"]
    F_pad = w1.shape[1]
    num_labels = w2.shape[1]
    assert w1.shape[0] == hidden, (w1.shape, hidden)

    # Row tiling: large tiles (near HBM roofline) while aiming for grid >= 2 so the
    # "parallel" axis pipelines and shards across v7x's two TensorCores.
    if tm is None:
        tm = max(16, _round_up(pl.cdiv(N, 2), 16))
        tm = min(tm, 2048)
    tm = max(8, min(tm, _round_up(N, 8)))     # never exceed (rounded) N

    grid = (pl.cdiv(N, tm),)                  # ragged last block; no host-side row pad
    const = lambda i: (0, 0)

    w_itemsize = jnp.dtype(w1.dtype).itemsize
    cost = pl.CostEstimate(
        flops=2 * N * (hidden * F_pad + F_pad * num_labels),
        transcendentals=0,
        bytes_accessed=(N * hidden * 4                      # x (f32, read once)
                        + N * num_labels * 4                # narrow f32 output
                        + (hidden * F_pad + F_pad * num_labels) * w_itemsize
                        + (F_pad + num_labels) * 4),        # biases
    )

    out2d = pl.pallas_call(
        _classifier_kernel,
        out_shape=jax.ShapeDtypeStruct((N, num_labels), jnp.float32),
        grid_spec=pltpu.PrefetchScalarGridSpec(
            num_scalar_prefetch=0,
            grid=grid,
            in_specs=[
                pl.BlockSpec((tm, hidden), lambda i: (i, 0)),      # x rows (f32)
                pl.BlockSpec((hidden, F_pad), const),              # folded W1'
                pl.BlockSpec((1, F_pad), const),                   # folded b1'
                pl.BlockSpec((F_pad, num_labels), const),          # padded W2^T (narrow)
                pl.BlockSpec((1, num_labels), const),              # b2 (narrow)
            ],
            out_specs=pl.BlockSpec((tm, num_labels), lambda i: (i, 0)),
        ),
        compiler_params=pltpu.CompilerParams(
            dimension_semantics=("parallel",)),
        cost_estimate=cost,
    )(x2d, w1, b1, w2, b2)

    return out2d.reshape(batch, seq_len, num_labels)


def _reference_forward(x, params):
    """Pure-JAX reference (same eval-mode semantics), full-precision matmuls."""
    batch, seq_len, hidden = x.shape
    eps = 1e-5
    x2d = x.reshape(-1, hidden)
    xb = ((x2d - params["bn_mean"]) / jnp.sqrt(params["bn_var"] + eps)
          * params["bn_gamma"] + params["bn_beta"])
    h = jnp.dot(xb, params["fc1_w"].T,
                precision=jax.lax.Precision.HIGHEST) + params["fc1_b"]
    h = ((h - params["bn1_mean"]) / jnp.sqrt(params["bn1_var"] + eps)
         * params["bn1_gamma"] + params["bn1_beta"])
    h = jnp.maximum(h, 0.0)
    out = jnp.dot(h, params["fc_out_w"].T,
                  precision=jax.lax.Precision.HIGHEST) + params["fc_out_b"]
    return out.reshape(batch, seq_len, -1)


def init_params(key, hidden_size, num_labels, fc_hidden_size):
    ks = jax.random.split(key, 8)
    p = {}
    # BatchNorm1d(hidden_size): non-trivial deterministic running stats.
    p["bn_gamma"] = 1.0 + 0.1 * jax.random.normal(ks[0], (hidden_size,), jnp.float32)
    p["bn_beta"] = 0.1 * jax.random.normal(ks[1], (hidden_size,), jnp.float32)
    p["bn_mean"] = 0.05 * jax.random.normal(ks[2], (hidden_size,), jnp.float32)
    p["bn_var"] = jnp.abs(1.0 + 0.1 * jax.random.normal(ks[3], (hidden_size,), jnp.float32))
    # Linear(hidden_size, fc_hidden_size)
    lim1 = 1.0 / jnp.sqrt(hidden_size)
    p["fc1_w"] = jax.random.uniform(ks[4], (fc_hidden_size, hidden_size), jnp.float32, -lim1, lim1)
    p["fc1_b"] = jax.random.uniform(ks[5], (fc_hidden_size,), jnp.float32, -lim1, lim1)
    # BatchNorm1d(fc_hidden_size)
    p["bn1_gamma"] = 1.0 + 0.05 * jax.random.normal(ks[0], (fc_hidden_size,), jnp.float32)
    p["bn1_beta"] = 0.05 * jax.random.normal(ks[1], (fc_hidden_size,), jnp.float32)
    p["bn1_mean"] = 0.02 * jax.random.normal(ks[2], (fc_hidden_size,), jnp.float32)
    p["bn1_var"] = jnp.abs(1.0 + 0.05 * jax.random.normal(ks[3], (fc_hidden_size,), jnp.float32))
    # Linear(fc_hidden_size, num_labels)
    lim2 = 1.0 / jnp.sqrt(fc_hidden_size)
    p["fc_out_w"] = jax.random.uniform(ks[6], (num_labels, fc_hidden_size), jnp.float32, -lim2, lim2)
    p["fc_out_b"] = jax.random.uniform(ks[7], (num_labels,), jnp.float32, -lim2, lim2)
    return p


if __name__ == "__main__":
    batch, seq_len = 2, 8
    hidden_size, num_labels, fc_hidden_size = 32, 2, 500

    key = jax.random.PRNGKey(0)
    kx, kp = jax.random.split(key)
    x = jax.random.normal(kx, (batch, seq_len, hidden_size), jnp.float32)
    params = init_params(kp, hidden_size, num_labels, fc_hidden_size)

    ref = _reference_forward(x, params)

    # Production configuration: bf16 weights / in-kernel bf16 cast, f32 accumulation.
    prepared_bf16 = jax.tree_util.tree_map(
        jax.block_until_ready,
        prepare_classifier_params(params, compute_dtype=jnp.bfloat16))
    out = jax.block_until_ready(custom_classifier_forward(x, prepared_bf16))
    assert out.shape == (batch, seq_len, num_labels), out.shape
    assert jnp.allclose(out, ref, atol=5e-2, rtol=5e-2), float(jnp.max(jnp.abs(out - ref)))

    # f32 compute path: validates that the BN folding / zero padding is exact.
    prepared_f32 = prepare_classifier_params(params, compute_dtype=jnp.float32)
    out_f32 = jax.block_until_ready(custom_classifier_forward(x, prepared_f32))
    assert jnp.allclose(out_f32, ref, atol=2e-3, rtol=2e-3), float(jnp.max(jnp.abs(out_f32 - ref)))

    print("KERNEL_OK")
</pallas_src>

<mosaic_0001>
module attributes {stable_mosaic.version = 11 : i64} {
  func.func @_classifier_kernel(%arg0: i32, %arg1: memref<16x32xf32, #tpu.memory_space<vmem>>, %arg2: memref<32x512xbf16, #tpu.memory_space<vmem>>, %arg3: memref<1x512xf32, #tpu.memory_space<vmem>>, %arg4: memref<512x2xbf16, #tpu.memory_space<vmem>>, %arg5: memref<1x2xf32, #tpu.memory_space<vmem>>, %arg6: memref<16x2xf32, #tpu.memory_space<vmem>>) attributes {dimension_semantics = [#tpu.dimension_semantics<parallel>], iteration_bounds = array<i64: 1>, scalar_prefetch = 0 : i64, scratch_operands = 0 : i64, tpu.core_type = #tpu.core_type<tc>, window_params = [{transform_indices = @transform_0, window_bounds = array<i64: 16, 32>}, {pipeline_mode = #tpu.pipeline_mode<synchronous>, transform_indices = @transform_1, window_bounds = array<i64: 32, 512>}, {pipeline_mode = #tpu.pipeline_mode<synchronous>, transform_indices = @transform_2, window_bounds = array<i64: 1, 512>}, {pipeline_mode = #tpu.pipeline_mode<synchronous>, transform_indices = @transform_3, window_bounds = array<i64: 512, 2>}, {pipeline_mode = #tpu.pipeline_mode<synchronous>, transform_indices = @transform_4, window_bounds = array<i64: 1, 2>}, {transform_indices = @transform_5, window_bounds = array<i64: 16, 2>}]} {
    %c0 = arith.constant 0 : index
    %c0_0 = arith.constant 0 : index
    %0 = vector.load %arg1[%c0, %c0_0] : memref<16x32xf32, #tpu.memory_space<vmem>>, vector<16x32xf32>
    %1 = arith.truncf %0 : vector<16x32xf32> to vector<16x32xbf16>
    %c0_1 = arith.constant 0 : index
    %c0_2 = arith.constant 0 : index
    %2 = vector.load %arg2[%c0_1, %c0_2] : memref<32x512xbf16, #tpu.memory_space<vmem>>, vector<32x512xbf16>
    %cst = arith.constant dense<0.000000e+00> : vector<16x512xf32>
    %3 = tpu.matmul %1, %2, %cst {dimension_numbers = #tpu.dot_dimension_numbers<[1], [0], [0], [1], [0, 0, 1, 1], [], []>} : vector<16x32xbf16>, vector<32x512xbf16>, vector<16x512xf32> -> vector<16x512xf32>
    %c0_3 = arith.constant 0 : index
    %c0_4 = arith.constant 0 : index
    %4 = vector.load %arg3[%c0_3, %c0_4] : memref<1x512xf32, #tpu.memory_space<vmem>>, vector<1x512xf32>
    %5 = vector.broadcast %4 : vector<1x512xf32> to vector<16x512xf32>
    %6 = arith.addf %3, %5 : vector<16x512xf32>
    %cst_5 = arith.constant 0.000000e+00 : f32
    %7 = vector.broadcast %cst_5 : f32 to vector<16x512xf32>
    %8 = arith.maximumf %6, %7 : vector<16x512xf32>
    %9 = arith.truncf %8 : vector<16x512xf32> to vector<16x512xbf16>
    %c0_6 = arith.constant 0 : index
    %c0_7 = arith.constant 0 : index
    %10 = vector.load %arg4[%c0_6, %c0_7] : memref<512x2xbf16, #tpu.memory_space<vmem>>, vector<512x2xbf16>
    %cst_8 = arith.constant dense<0.000000e+00> : vector<16x2xf32>
    %11 = tpu.matmul %9, %10, %cst_8 {dimension_numbers = #tpu.dot_dimension_numbers<[1], [0], [0], [1], [0, 0, 1, 1], [], []>} : vector<16x512xbf16>, vector<512x2xbf16>, vector<16x2xf32> -> vector<16x2xf32>
    %c0_9 = arith.constant 0 : index
    %c0_10 = arith.constant 0 : index
    %12 = vector.load %arg5[%c0_9, %c0_10] : memref<1x2xf32, #tpu.memory_space<vmem>>, vector<1x2xf32>
    %13 = vector.broadcast %12 : vector<1x2xf32> to vector<16x2xf32>
    %14 = arith.addf %11, %13 : vector<16x2xf32>
    %c0_11 = arith.constant 0 : index
    %c0_12 = arith.constant 0 : index
    %15 = vector.load %arg6[%c0_11, %c0_12] : memref<16x2xf32, #tpu.memory_space<vmem>>, vector<16x2xf32>
    tpu.vector_store %arg6[%c0_11, %c0_12], %14 {strides = array<i32>} : memref<16x2xf32, #tpu.memory_space<vmem>>, vector<16x2xf32>,
    return
  }
  func.func @transform_0(%arg0: i32) -> (i32, i32) {
    %c0_i32 = arith.constant 0 : i32
    %c0_i32_0 = arith.constant 0 : i32
    return %arg0, %c0_i32 : i32, i32
  }
  func.func @transform_1(%arg0: i32) -> (i32, i32) {
    %c0_i32 = arith.constant 0 : i32
    %c0_i32_0 = arith.constant 0 : i32
    %c0_i32_1 = arith.constant 0 : i32
    return %c0_i32, %c0_i32_0 : i32, i32
  }
  func.func @transform_2(%arg0: i32) -> (i32, i32) {
    %c0_i32 = arith.constant 0 : i32
    %c0_i32_0 = arith.constant 0 : i32
    %c0_i32_1 = arith.constant 0 : i32
    return %c0_i32, %c0_i32_0 : i32, i32
  }
  func.func @transform_3(%arg0: i32) -> (i32, i32) {
    %c0_i32 = arith.constant 0 : i32
    %c0_i32_0 = arith.constant 0 : i32
    %c0_i32_1 = arith.constant 0 : i32
    return %c0_i32, %c0_i32_0 : i32, i32
  }
  func.func @transform_4(%arg0: i32) -> (i32, i32) {
    %c0_i32 = arith.constant 0 : i32
    %c0_i32_0 = arith.constant 0 : i32
    %c0_i32_1 = arith.constant 0 : i32
    return %c0_i32, %c0_i32_0 : i32, i32
  }
  func.func @transform_5(%arg0: i32) -> (i32, i32) {
    %c0_i32 = arith.constant 0 : i32
    %c0_i32_0 = arith.constant 0 : i32
    return %arg0, %c0_i32 : i32, i32
  }
}

</mosaic_0001>

<bundles_post_ra>
// kernel: custom_classifier_forward.1
= control target key start
LH: loop header
LB: loop body
LE: loop exit
PB: predicated region body
PF: predicated region fallthrough
CT: control target
= control target key end

     0   :  { %v680_v1 = vmov 0   ;;  %vm94_vm0 = vcmask 261120   ;;  %v34_v44 = vlaneseq  ;;  %vm541_vm1 = vcmask 15360   ;;  %s849_s1 = inlined_call_operand.vmem [shape: bf16[32,512], index: 1, kind: input, shape index: {}]   ;;  %s850_s0 = inlined_call_operand.vmem [shape: f32[16,32], index: 0, kind: input, shape index: {}]   ;;  %s851_s3 = inlined_call_operand.vmem [shape: bf16[512,2], index: 3, kind: input, shape index: {}]   ;;  %s852_s2 = inlined_call_operand.vmem [shape: f32[1,512], index: 2, kind: input, shape index: {}]   ;;  %s853_s4 = inlined_call_operand.vmem [shape: f32[1,2], index: 4, kind: input, shape index: {}]   ;;  %s854_s5 = inlined_call_operand.vmem [shape: f32[16,2], index: 5, kind: output, shape index: {}]  }
   0x1   :  { %v636_v0 = vld [vmem:[%s849_s1 + $0x24] ss:$16 sps:$4 sm:$0xff]   ;;  %130 = vmatprep.mubr.bf16.mxu0 %v680_v1  ;;  %173 = vmatprep.mubr.bf16.mxu1 %v680_v1  ;;  %v638_v2 = vld [vmem:[%s849_s1 + $0x2c] ss:$16 sps:$4 sm:$0xff]   ;;  %v640_v3 = vld [vmem:[%s849_s1 + $0x20] ss:$16 sps:$4 sm:$0xff]  }
   0x2   :  { %110 = vmatprep.subr.bf16.mxu0 %v636_v0  ;;  %v641_v4 = vld [vmem:[%s849_s1 + $0x28] ss:$16 sps:$4 sm:$0xff]   ;;  %153 = vmatprep.subr.bf16.mxu1 %v638_v2  ;;  %v642_v5 = vld [vmem:[%s849_s1 + $0x4] ss:$16 sps:$4 sm:$0xff]   ;;  %v644_v6 = vld [vmem:[%s849_s1 + $0xc] ss:$16 sps:$4 sm:$0xff]  }
   0x3   :  { %111 = vmatpush1.bf16.msra.mxu0 %v640_v3  ;;  %154 = vmatpush1.bf16.msra.mxu1 %v641_v4  ;;  %v646_v7 = vld [vmem:[%s849_s1] ss:$16 sps:$4 sm:$0xff]   ;;  %v647_v8 = vld [vmem:[%s849_s1 + $0x8] ss:$16 sps:$4 sm:$0xff]   ;;  %v35_v45 = vshrl.u32 %v34_v44, 7 }
   0x4   :  { %112 = vmatprep.subr.bf16.mxu0 %v642_v5  ;;  %v21_v9 = vld [vmem:[%s850_s0] sm:$0xff]  ;;  %v22_v10 = vld [vmem:[%s850_s0 + $0x8] sm:$0xff]  ;;  %155 = vmatprep.subr.bf16.mxu1 %v644_v6  ;;  %v648_v11 = vld [vmem:[%s851_s3 + $0x78] sm:$0xff]  }
   0x5   :  { %v23_v12 = vpack.c.bf16 %v22_v10, %v21_v9  ;;  %v649_v13 = vld [vmem:[%s851_s3 + $0xf8] sm:$0xff]   ;;  %v652_v16 = vld [vmem:[%s851_s3 + $0x70] sm:$0xff]   ;;  %v656_v20 = vld [vmem:[%s851_s3 + $0x68] sm:$0xff]   ;;  %v40_v46 = vsub.s32 1, %v35_v45  ;;  %v48_v47 = vsub.s32 3, %v35_v45  ;;  %v36_v48 = vsub.s32 0, %v35_v45 }
   0x6   :  { %v650_v14 = vld [vmem:[%s851_s3 + $0x38] sm:$0xff]   ;;  %v653_v17 = vld [vmem:[%s851_s3 + $0xf0] sm:$0xff]   ;;  %v657_v21 = vld [vmem:[%s851_s3 + $0xe8] sm:$0xff]   ;;  %v44_v49 = vsub.s32 2, %v35_v45 }
   0x7   :  { %113 = vmatpush1.bf16.msra.mxu0 %v646_v7  ;;  %156 = vmatpush1.bf16.msra.mxu1 %v647_v8  ;;  %v651_v15 = vld [vmem:[%s851_s3 + $0xb8] sm:$0xff]   ;;  %v654_v18 = vld [vmem:[%s851_s3 + $0x30] sm:$0xff]   ;;  %v658_v22 = vld [vmem:[%s851_s3 + $0x28] sm:$0xff]  }
   0x8   :  { %591 = vmatprep.subr.bf16.mxu0 %v648_v11  ;;  %613 = vmatprep.subr.bf16.mxu1 %v649_v13  ;;  %v655_v19 = vld [vmem:[%s851_s3 + $0xb0] sm:$0xff]   ;;  %v659_v23 = vld [vmem:[%s851_s3 + $0xa8] sm:$0xff]   ;;  %v660_v24 = vld [vmem:[%s851_s3 + $0x60] sm:$0xff]  }
   0x9   :  { %v661_v25 = vld [vmem:[%s851_s3 + $0xe0] sm:$0xff]   ;;  %v664_v28 = vld [vmem:[%s851_s3 + $0x58] sm:$0xff]   ;;  %v668_v32 = vld [vmem:[%s851_s3 + $0x50] sm:$0xff]  }
   0xa   :  { %556 = vmatmul.mubr.msk.bf16.vlgmr.msra.gmra.mxu0 %vm94_vm0, %v23_v12  ;;  %557 = vmatmul.mubr.msk.bf16.vlgmr.msra.gmra.mxu1 %vm94_vm0, %v23_v12  ;;  %v662_v26 = vld [vmem:[%s851_s3 + $0x20] sm:$0xff]   ;;  %v665_v29 = vld [vmem:[%s851_s3 + $0xd8] sm:$0xff]   ;;  %v669_v33 = vld [vmem:[%s851_s3 + $0xd0] sm:$0xff]  }
   0xb   :  { %592 = vmatpush3.bf16.msra.mxu0 %v650_v14  ;;  %614 = vmatpush3.bf16.msra.mxu1 %v651_v15  ;;  %v663_v27 = vld [vmem:[%s851_s3 + $0xa0] sm:$0xff]   ;;  %v666_v30 = vld [vmem:[%s851_s3 + $0x18] sm:$0xff]   ;;  %v670_v34 = vld [vmem:[%s851_s3 + $0x10] sm:$0xff]  }
   0xc   :  { %593 = vmatprep.subr.bf16.mxu0 %v652_v16  ;;  %615 = vmatprep.subr.bf16.mxu1 %v653_v17  ;;  %v667_v31 = vld [vmem:[%s851_s3 + $0x98] sm:$0xff]   ;;  %v671_v35 = vld [vmem:[%s851_s3 + $0x90] sm:$0xff]   ;;  %v672_v36 = vld [vmem:[%s851_s3 + $0x48] sm:$0xff]  }
   0xd   :  { %v673_v37 = vld [vmem:[%s851_s3 + $0xc8] sm:$0xff]   ;;  %v676_v40 = vld [vmem:[%s851_s3 + $0x40] sm:$0xff]  }
   0xe   :  { %v674_v38 = vld [vmem:[%s851_s3 + $0x8] sm:$0xff]   ;;  %v677_v41 = vld [vmem:[%s851_s3 + $0xc0] sm:$0xff]  }
   0xf   :  { %594 = vmatpush3.bf16.msra.mxu0 %v654_v18  ;;  %616 = vmatpush3.bf16.msra.mxu1 %v655_v19  ;;  %v675_v39 = vld [vmem:[%s851_s3 + $0x88] sm:$0xff]   ;;  %v678_v42 = vld [vmem:[%s851_s3] sm:$0xff]  }
  0x10   :  { %595 = vmatprep.subr.bf16.mxu0 %v656_v20  ;;  %617 = vmatprep.subr.bf16.mxu1 %v657_v21  ;;  %v679_v43 = vld [vmem:[%s851_s3 + $0x80] sm:$0xff]  }
  0x11   :  { %v32_v50 = vld [vmem:[%s852_s2] sm:$0xf] }
  0x12   :  { %v41_v53 = vrot.slane %v32_v50, %v40_v46  ;;  %v49_v54 = vrot.slane %v32_v50, %v48_v47  ;;  %v37_v55 = vrot.slane %v32_v50, %v36_v48  ;;  %v45_v56 = vrot.slane %v32_v50, %v44_v49  ;;  %v558_v21 = vld [vmem:[%s853_s4] ss:$0 sm:$0xff] }
  0x13   :  { %596 = vmatpush3.bf16.msra.mxu0 %v658_v22  ;;  %618 = vmatpush3.bf16.msra.mxu1 %v659_v23 }
  0x14   :  { %597 = vmatprep.subr.bf16.mxu0 %v660_v24  ;;  %619 = vmatprep.subr.bf16.mxu1 %v661_v25 }
  0x17   :  { %598 = vmatpush3.bf16.msra.mxu0 %v662_v26  ;;  %620 = vmatpush3.bf16.msra.mxu1 %v663_v27 }
  0x18   :  { %599 = vmatprep.subr.bf16.mxu0 %v664_v28  ;;  %621 = vmatprep.subr.bf16.mxu1 %v665_v29 }
  0x1b   :  { %600 = vmatpush3.bf16.msra.mxu0 %v666_v30  ;;  %622 = vmatpush3.bf16.msra.mxu1 %v667_v31 }
  0x1c   :  { %601 = vmatprep.subr.bf16.mxu0 %v668_v32  ;;  %623 = vmatprep.subr.bf16.mxu1 %v669_v33 }
  0x1f   :  { %602 = vmatpush3.bf16.msra.mxu0 %v670_v34  ;;  %624 = vmatpush3.bf16.msra.mxu1 %v671_v35 }
  0x20   :  { %603 = vmatprep.subr.bf16.mxu0 %v672_v36  ;;  %625 = vmatprep.subr.bf16.mxu1 %v673_v37 }
  0x23   :  { %604 = vmatpush3.bf16.msra.mxu0 %v674_v38  ;;  %626 = vmatpush3.bf16.msra.mxu1 %v675_v39 }
  0x24   :  { %605 = vmatprep.subr.bf16.mxu0 %v676_v40  ;;  %627 = vmatprep.subr.bf16.mxu1 %v677_v41 }
  0x27   :  { %606 = vmatpush3.bf16.msra.mxu0 %v678_v42  ;;  %628 = vmatpush3.bf16.msra.mxu1 %v679_v43 }
  0xca   :  { %v132_v51 = vpop.f32.mrf.mxu0  ;;  %v175_v52 = vpop.f32.mrf.mxu1 }
  0xcb   :  { %v133_v1 = vadd.f32 %v132_v51, %v37_v55  ;;  %v176_v2 = vadd.f32 %v175_v52, %v45_v56 }
  0xcc   :  { %v134_v57 = vpop.f32.mrf.mxu0  ;;  %v177_v58 = vpop.f32.mrf.mxu1 }
  0xcd   :  { %v135_v61 = vadd.f32 %v134_v57, %v41_v53  ;;  %v178_v62 = vadd.f32 %v177_v58, %v49_v54  ;;  %v184_v13 = vmax.f32 %v133_v1, 0.0  ;;  %v186_v14 = vmax.f32 %v176_v2, 0.0 }
  0xce   :  { %v136_v59 = vpop.f32.mrf.mxu0  ;;  %v179_v60 = vpop.f32.mrf.mxu1 }
  0xcf   :  { %v137_v63 = vadd.f32 %v136_v59, %v37_v55  ;;  %v180_v0 = vadd.f32 %v179_v60, %v45_v56  ;;  %v185_v9 = vmax.f32 %v135_v61, 0.0  ;;  %v187_v10 = vmax.f32 %v178_v62, 0.0 }
  0xd0   :  { %v138_v3 = vpop.f32.mrf.mxu0  ;;  %v181_v4 = vpop.f32.mrf.mxu1 }
  0xd1   :  { %v139_v5 = vadd.f32 %v138_v3, %v41_v53  ;;  %v182_v6 = vadd.f32 %v181_v4, %v49_v54  ;;  %v188_v7 = vmax.f32 %v137_v63, 0.0  ;;  %v190_v8 = vmax.f32 %v180_v0, 0.0 }
  0xd3   :  { %v189_v11 = vmax.f32 %v139_v5, 0.0  ;;  %v191_v12 = vmax.f32 %v182_v6, 0.0  ;;  %v192_v17 = vpack.c.bf16 %v188_v7, %v184_v13  ;;  %v194_v18 = vpack.c.bf16 %v190_v8, %v186_v14 }
  0xd5   :  { %v193_v15 = vpack.c.bf16 %v189_v11, %v185_v9  ;;  %v195_v16 = vpack.c.bf16 %v191_v12, %v187_v10 }
  0xd7   :  { %491 = vmatprep.mubr.bf16.mxu0 %v193_v15  ;;  %532 = vmatprep.mubr.bf16.mxu1 %v195_v16 }
  0xd8   :  { %492 = vmatmul.mubr.bf16.vlgmr.msra.gmra.mxu0 %v192_v17  ;;  %533 = vmatmul.mubr.bf16.vlgmr.msra.gmra.mxu1 %v194_v18 }
 0x198   :  { %v607_v19 = vpop.f32.mrf.mxu0  ;;  %v629_v20 = vpop.f32.mrf.mxu1 }
 0x19a   :  { %v608_v22 = vpop.f32.mrf.mxu0  ;;  %v630_v23 = vpop.f32.mrf.mxu1 }
 0x19b   :  { %v609_v24 = vadd.f32 %v608_v22, %v607_v19  ;;  %v631_v28 = vadd.f32 %v630_v23, %v629_v20 }
 0x19c   :  { %v610_v25 = vpop.f32.mrf.mxu0  ;;  %v632_v26 = vpop.f32.mrf.mxu1 }
 0x19d   :  { %v494_v27 = vadd.f32 %v609_v24, %v558_v21 }
 0x19e   :  { %v611_v29 = vpop.f32.mrf.mxu0  ;;  %v633_v30 = vpop.f32.mrf.mxu1 }
 0x19f   :  { %v535_v31 = vadd.f32 %v631_v28, %v494_v27  ;;  %v612_v32 = vadd.f32 %v611_v29, %v610_v25  ;;  %v634_v34 = vadd.f32 %v633_v30, %v632_v26 }
 0x1a1   :  { %542 = vst.msk [vmem:[%s854_s5] sm:$0xff] %vm541_vm1, %v535_v31  ;;  %v497_v33 = vadd.f32 %v612_v32, %v558_v21 }
 0x1a3   :  { %v538_v35 = vadd.f32 %v634_v34, %v497_v33 }
 0x1a5   :  { %543 = vst.msk [vmem:[%s854_s5 + $0x8] sm:$0xff] %vm541_vm1, %v538_v35 }

</bundles_post_ra>
